<compile_context>
chip_gen: v7x
topology: tpu7x:2x2x1
jax: 0.10.0
libtpu: 0.0.40
codegen_flags: <defaults>
</compile_context>

<pallas_src>
import functools
import math

import jax
import jax.numpy as jnp
from jax.experimental import pallas as pl
from jax.experimental.pallas import tpu as pltpu


_VMEM_LIMIT = 48 * 1024 * 1024  # fits scoped VMEM on v5e/v6e (128 MiB) and v7x (64 MiB)


def _pick_tile(dim, pref, align):
    """Largest tile <= pref that is a multiple of `align` and divides `dim`;
    falls back to the full dim (block == full array dim is always legal)."""
    if dim <= pref:
        return dim
    t = (pref // align) * align
    while t >= align:
        if dim % t == 0:
            return t
        t -= align
    return dim


# ----------------------------------------------------------------------------
# Tiled dense: y = act(x @ W + b)   (bf16 MXU operands, f32 accumulation)
# ----------------------------------------------------------------------------

def _dense_kernel(x_ref, w_ref, b_ref, o_ref, acc_ref, *, activation):
    @pl.when(pl.program_id(2) == 0)
    def _():
        acc_ref[...] = jnp.zeros_like(acc_ref)

    acc_ref[...] += jnp.dot(x_ref[...], w_ref[...],
                            preferred_element_type=jnp.float32)

    @pl.when(pl.program_id(2) == pl.num_programs(2) - 1)
    def _():
        y = acc_ref[...] + b_ref[...]
        if activation == "gelu":
            # erf-exact GELU, matches HF RobertaIntermediate ('gelu').
            y = 0.5 * y * (1.0 + jax.lax.erf(y * (1.0 / math.sqrt(2.0))))
        o_ref[...] = y.astype(o_ref.dtype)


def dense(x, w, b, activation=None):
    """x:(M,K) bf16, w:(K,N) bf16, b:(N,) f32 -> (M,N) bf16."""
    M, K = x.shape
    N = w.shape[1]
    tm = _pick_tile(M, 256, 8)
    tk = _pick_tile(K, 512, 128)
    tn = _pick_tile(N, 512, 128)
    kern = functools.partial(_dense_kernel, activation=activation)
    return pl.pallas_call(
        kern,
        out_shape=jax.ShapeDtypeStruct((M, N), jnp.bfloat16),
        grid=(M // tm, N // tn, K // tk),
        in_specs=[
            pl.BlockSpec((tm, tk), lambda i, j, k: (i, k)),
            pl.BlockSpec((tk, tn), lambda i, j, k: (k, j)),
            pl.BlockSpec((1, tn), lambda i, j, k: (0, j)),
        ],
        out_specs=pl.BlockSpec((tm, tn), lambda i, j, k: (i, j)),
        scratch_shapes=[pltpu.VMEM((tm, tn), jnp.float32)],
        compiler_params=pltpu.CompilerParams(
            dimension_semantics=("parallel", "parallel", "arbitrary"),
            vmem_limit_bytes=_VMEM_LIMIT),
    )(x, w, b.reshape(1, N).astype(jnp.float32))


# ----------------------------------------------------------------------------
# Fused: y = LayerNorm(x @ W + b + residual) * gamma + beta
# ----------------------------------------------------------------------------

def _dense_add_ln_kernel(x_ref, w_ref, b_ref, r_ref, g_ref, bln_ref,
                         o_ref, acc_ref, *, eps):
    @pl.when(pl.program_id(1) == 0)
    def _():
        acc_ref[...] = jnp.zeros_like(acc_ref)

    acc_ref[...] += jnp.dot(x_ref[...], w_ref[...],
                            preferred_element_type=jnp.float32)

    @pl.when(pl.program_id(1) == pl.num_programs(1) - 1)
    def _():
        y = acc_ref[...] + b_ref[...] + r_ref[...].astype(jnp.float32)
        mu = jnp.mean(y, axis=-1, keepdims=True)
        var = jnp.mean(jnp.square(y - mu), axis=-1, keepdims=True)
        yn = (y - mu) * jax.lax.rsqrt(var + eps)
        o_ref[...] = (yn * g_ref[...] + bln_ref[...]).astype(o_ref.dtype)


def dense_add_layernorm(x, w, b, residual, gamma, beta, eps):
    """x:(M,K) bf16, w:(K,N) bf16, residual:(M,N) bf16 -> (M,N) bf16."""
    M, K = x.shape
    N = w.shape[1]
    tm = _pick_tile(M, 256, 8)
    tk = _pick_tile(K, 512, 128)
    kern = functools.partial(_dense_add_ln_kernel, eps=eps)
    return pl.pallas_call(
        kern,
        out_shape=jax.ShapeDtypeStruct((M, N), jnp.bfloat16),
        grid=(M // tm, K // tk),
        in_specs=[
            pl.BlockSpec((tm, tk), lambda i, k: (i, k)),
            pl.BlockSpec((tk, N), lambda i, k: (k, 0)),
            pl.BlockSpec((1, N), lambda i, k: (0, 0)),
            pl.BlockSpec((tm, N), lambda i, k: (i, 0)),
            pl.BlockSpec((1, N), lambda i, k: (0, 0)),
            pl.BlockSpec((1, N), lambda i, k: (0, 0)),
        ],
        out_specs=pl.BlockSpec((tm, N), lambda i, k: (i, 0)),
        scratch_shapes=[pltpu.VMEM((tm, N), jnp.float32)],
        compiler_params=pltpu.CompilerParams(
            dimension_semantics=("parallel", "arbitrary"),
            vmem_limit_bytes=_VMEM_LIMIT),
    )(x, w, b.reshape(1, N).astype(jnp.float32), residual,
      gamma.reshape(1, N), beta.reshape(1, N))


# ----------------------------------------------------------------------------
# Plain LayerNorm (embedding stage; no zero-residual streamed through HBM)
# ----------------------------------------------------------------------------

def _ln_kernel(x_ref, g_ref, b_ref, o_ref, *, eps):
    x = x_ref[...].astype(jnp.float32)
    mu = jnp.mean(x, axis=-1, keepdims=True)
    var = jnp.mean(jnp.square(x - mu), axis=-1, keepdims=True)
    y = (x - mu) * jax.lax.rsqrt(var + eps)
    o_ref[...] = (y * g_ref[...] + b_ref[...]).astype(o_ref.dtype)


def layernorm(x, gamma, beta, eps):
    M, H = x.shape
    tm = _pick_tile(M, 512, 8)
    kern = functools.partial(_ln_kernel, eps=eps)
    return pl.pallas_call(
        kern,
        out_shape=jax.ShapeDtypeStruct((M, H), jnp.bfloat16),
        grid=(M // tm,),
        in_specs=[pl.BlockSpec((tm, H), lambda i: (i, 0)),
                  pl.BlockSpec((1, H), lambda i: (0, 0)),
                  pl.BlockSpec((1, H), lambda i: (0, 0))],
        out_specs=pl.BlockSpec((tm, H), lambda i: (i, 0)),
        compiler_params=pltpu.CompilerParams(
            dimension_semantics=("parallel",),
            vmem_limit_bytes=_VMEM_LIMIT),
    )(x, gamma.reshape(1, H), beta.reshape(1, H))


# ----------------------------------------------------------------------------
# Multi-head self-attention: one grid step per batch, all heads inside,
# lane-dense (S, H) context output, f32 softmax, bf16 MXU operands.
# ----------------------------------------------------------------------------

def _attn_kernel(qkv_ref, bias_ref, o_ref, *, n_heads, head_dim, hidden, scale):
    qkv = qkv_ref[0]            # (S, 3H) bf16  -- [Q | K | V] along last axis
    bias = bias_ref[0]          # (1, S)  f32 additive mask (shared by heads)
    ctx_heads = []
    for h in range(n_heads):
        q = qkv[:, h * head_dim:(h + 1) * head_dim]
        k = qkv[:, hidden + h * head_dim:hidden + (h + 1) * head_dim]
        v = qkv[:, 2 * hidden + h * head_dim:2 * hidden + (h + 1) * head_dim]
        s = jax.lax.dot_general(q, k, (((1,), (1,)), ((), ())),
                                preferred_element_type=jnp.float32) * scale
        s = s + bias                          # f32 before the -1e9 mask add
        m = jnp.max(s, axis=-1, keepdims=True)
        p = jnp.exp(s - m)
        inv = pl.reciprocal(jnp.sum(p, axis=-1, keepdims=True), approx=True)
        p = p * inv
        ctx_heads.append(jnp.dot(p.astype(jnp.bfloat16), v,
                                 preferred_element_type=jnp.float32))
    ctx = jnp.concatenate(ctx_heads, axis=-1)   # (S, H) lane-dense store
    o_ref[0] = ctx.astype(o_ref.dtype)


def attention(qkv, bias, n_heads):
    """qkv: (B, S, 3H) bf16; bias: (B, 1, S) f32 -> context (B, S, H) bf16."""
    B, S, H3 = qkv.shape
    H = H3 // 3
    Dh = H // n_heads
    kern = functools.partial(_attn_kernel, n_heads=n_heads, head_dim=Dh,
                             hidden=H, scale=1.0 / math.sqrt(Dh))
    return pl.pallas_call(
        kern,
        out_shape=jax.ShapeDtypeStruct((B, S, H), jnp.bfloat16),
        grid=(B,),
        in_specs=[pl.BlockSpec((1, S, H3), lambda b: (b, 0, 0)),
                  pl.BlockSpec((1, 1, S), lambda b: (b, 0, 0))],
        out_specs=pl.BlockSpec((1, S, H), lambda b: (b, 0, 0)),
        compiler_params=pltpu.CompilerParams(
            dimension_semantics=("parallel",),
            vmem_limit_bytes=_VMEM_LIMIT),
    )(qkv, bias)


# ----------------------------------------------------------------------------
# Deterministic synthetic parameters (shapes from a RobertaConfig-like config)
# ----------------------------------------------------------------------------

def init_params(key, cfg):
    H, I, V, P = cfg["hidden"], cfg["intermediate"], cfg["vocab"], cfg["max_pos"]
    std = 0.02

    def nrm(k, shape):
        return std * jax.random.normal(k, shape, dtype=jnp.float32)

    keys = jax.random.split(key, 3 + 6 * cfg["layers"])
    params = {
        "word_emb": nrm(keys[0], (V, H)),
        "pos_emb": nrm(keys[1], (P, H)),
        "type_emb": nrm(keys[2], (2, H)),
        "emb_ln_g": jnp.ones((H,), jnp.float32),
        "emb_ln_b": jnp.zeros((H,), jnp.float32),
        "layers": [],
    }
    ki = 3
    for _ in range(cfg["layers"]):
        wq = nrm(keys[ki + 0], (H, H))
        wk = nrm(keys[ki + 1], (H, H))
        wv = nrm(keys[ki + 2], (H, H))
        layer = {
            # Fused QKV weight: one MXU pass over x per layer instead of three.
            "wqkv": jnp.concatenate([wq, wk, wv], axis=1).astype(jnp.bfloat16),
            "bqkv": jnp.zeros((3 * H,), jnp.float32),
            "wo": nrm(keys[ki + 3], (H, H)).astype(jnp.bfloat16),
            "bo": jnp.zeros((H,), jnp.float32),
            "ln1_g": jnp.ones((H,), jnp.float32),
            "ln1_b": jnp.zeros((H,), jnp.float32),
            "wi": nrm(keys[ki + 4], (H, I)).astype(jnp.bfloat16),
            "bi": jnp.zeros((I,), jnp.float32),
            "wo2": nrm(keys[ki + 5], (I, H)).astype(jnp.bfloat16),
            "bo2": jnp.zeros((H,), jnp.float32),
            "ln2_g": jnp.ones((H,), jnp.float32),
            "ln2_b": jnp.zeros((H,), jnp.float32),
        }
        ki += 6
        params["layers"].append(layer)
    return params


# ----------------------------------------------------------------------------
# RoBERTa encoder forward (glue in JAX, compute in the Pallas kernels above)
# ----------------------------------------------------------------------------

def roberta_forward(params, input_ids, attention_mask, cfg):
    B, S = input_ids.shape
    H, nH = cfg["hidden"], cfg["heads"]
    eps = cfg["eps"]
    pad_idx = cfg["pad_token_id"]

    # RoBERTa position ids: cumsum over non-pad tokens, offset by padding_idx.
    not_pad = (input_ids != pad_idx).astype(jnp.int32)
    position_ids = jnp.cumsum(not_pad, axis=1) * not_pad + pad_idx

    # TODO(synk): embedding gathers stay in XLA (data-dependent row gather);
    # only the LayerNorm is a Pallas kernel.
    emb = (params["word_emb"][input_ids]
           + params["pos_emb"][position_ids]
           + params["type_emb"][jnp.zeros_like(input_ids)])
    x = layernorm(emb.reshape(B * S, H).astype(jnp.float32),
                  params["emb_ln_g"], params["emb_ln_b"], eps)     # (B*S,H) bf16

    # Additive mask, one row per batch (shared by all heads inside the kernel).
    bias = ((1.0 - attention_mask.astype(jnp.float32)) * -1e9).reshape(B, 1, S)

    for layer in params["layers"]:
        qkv = dense(x, layer["wqkv"], layer["bqkv"])               # (B*S, 3H)
        ctx = attention(qkv.reshape(B, S, 3 * H), bias, nH)        # (B, S, H)
        x = dense_add_layernorm(ctx.reshape(B * S, H), layer["wo"], layer["bo"],
                                x, layer["ln1_g"], layer["ln1_b"], eps)
        inter = dense(x, layer["wi"], layer["bi"], activation="gelu")
        x = dense_add_layernorm(inter, layer["wo2"], layer["bo2"],
                                x, layer["ln2_g"], layer["ln2_b"], eps)

    return x.reshape(B, S, H).astype(jnp.float32)   # last_hidden_state


# ----------------------------------------------------------------------------
# Main
# ----------------------------------------------------------------------------

if __name__ == "__main__":
    cfg = dict(
        vocab=128,
        hidden=64,
        heads=4,
        layers=2,
        intermediate=128,
        max_pos=40,
        eps=1e-5,
        pad_token_id=1,
        bos_token_id=0,
        eos_token_id=2,
    )
    B, S = 2, 16

    key = jax.random.PRNGKey(0)
    k_param, k_ids = jax.random.split(key)
    params = init_params(k_param, cfg)

    # Deterministic synthetic token ids with some trailing padding in row 1.
    input_ids = jax.random.randint(k_ids, (B, S), 3, cfg["vocab"], dtype=jnp.int32)
    input_ids = input_ids.at[:, 0].set(cfg["bos_token_id"])
    input_ids = input_ids.at[0, S - 1].set(cfg["eos_token_id"])
    input_ids = input_ids.at[1, 11].set(cfg["eos_token_id"])
    input_ids = input_ids.at[1, 12:].set(cfg["pad_token_id"])
    attention_mask = (input_ids != cfg["pad_token_id"]).astype(jnp.int32)

    out = roberta_forward(params, input_ids, attention_mask, cfg)
    out = jax.block_until_ready(out)
    assert out.shape == (B, S, cfg["hidden"])
    assert bool(jnp.all(jnp.isfinite(out)))
    print("KERNEL_OK")
</pallas_src>

<mosaic_0001>
module attributes {stable_mosaic.version = 11 : i64} {
  func.func @_ln_kernel(%arg0: i32, %arg1: memref<32x64xf32, #tpu.memory_space<vmem>>, %arg2: memref<1x64xf32, #tpu.memory_space<vmem>>, %arg3: memref<1x64xf32, #tpu.memory_space<vmem>>, %arg4: memref<32x64xbf16, #tpu.memory_space<vmem>>) attributes {dimension_semantics = [#tpu.dimension_semantics<parallel>], iteration_bounds = array<i64: 1>, scalar_prefetch = 0 : i64, scratch_operands = 0 : i64, tpu.core_type = #tpu.core_type<tc>, window_params = [{transform_indices = @transform_0, window_bounds = array<i64: 32, 64>}, {pipeline_mode = #tpu.pipeline_mode<synchronous>, transform_indices = @transform_1, window_bounds = array<i64: 1, 64>}, {pipeline_mode = #tpu.pipeline_mode<synchronous>, transform_indices = @transform_2, window_bounds = array<i64: 1, 64>}, {transform_indices = @transform_3, window_bounds = array<i64: 32, 64>}]} {
    %c0 = arith.constant 0 : index
    %c0_0 = arith.constant 0 : index
    %0 = vector.load %arg1[%c0, %c0_0] : memref<32x64xf32, #tpu.memory_space<vmem>>, vector<32x64xf32>
    %cst = arith.constant dense<0.000000e+00> : vector<32xf32>
    %1 = vector.multi_reduction <add>, %0, %cst [1] : vector<32x64xf32> to vector<32xf32>
    %2 = vector.shape_cast %1 : vector<32xf32> to vector<32x1xf32>
    %cst_1 = arith.constant 6.400000e+01 : f32
    %3 = vector.broadcast %cst_1 : f32 to vector<32x1xf32>
    %4 = arith.divf %2, %3 : vector<32x1xf32>
    %5 = vector.broadcast %4 : vector<32x1xf32> to vector<32x64xf32>
    %6 = arith.subf %0, %5 : vector<32x64xf32>
    %7 = arith.mulf %6, %6 : vector<32x64xf32>
    %cst_2 = arith.constant dense<0.000000e+00> : vector<32xf32>
    %8 = vector.multi_reduction <add>, %7, %cst_2 [1] : vector<32x64xf32> to vector<32xf32>
    %9 = vector.shape_cast %8 : vector<32xf32> to vector<32x1xf32>
    %cst_3 = arith.constant 6.400000e+01 : f32
    %10 = vector.broadcast %cst_3 : f32 to vector<32x1xf32>
    %11 = arith.divf %9, %10 : vector<32x1xf32>
    %12 = vector.broadcast %4 : vector<32x1xf32> to vector<32x64xf32>
    %13 = arith.subf %0, %12 : vector<32x64xf32>
    %cst_4 = arith.constant 9.99999974E-6 : f32
    %14 = vector.broadcast %cst_4 : f32 to vector<32x1xf32>
    %15 = arith.addf %11, %14 : vector<32x1xf32>
    %16 = math.rsqrt %15 : vector<32x1xf32>
    %17 = vector.broadcast %16 : vector<32x1xf32> to vector<32x64xf32>
    %18 = arith.mulf %13, %17 : vector<32x64xf32>
    %c0_5 = arith.constant 0 : index
    %c0_6 = arith.constant 0 : index
    %19 = vector.load %arg2[%c0_5, %c0_6] : memref<1x64xf32, #tpu.memory_space<vmem>>, vector<1x64xf32>
    %20 = vector.broadcast %19 : vector<1x64xf32> to vector<32x64xf32>
    %21 = arith.mulf %18, %20 : vector<32x64xf32>
    %c0_7 = arith.constant 0 : index
    %c0_8 = arith.constant 0 : index
    %22 = vector.load %arg3[%c0_7, %c0_8] : memref<1x64xf32, #tpu.memory_space<vmem>>, vector<1x64xf32>
    %23 = vector.broadcast %22 : vector<1x64xf32> to vector<32x64xf32>
    %24 = arith.addf %21, %23 : vector<32x64xf32>
    %25 = arith.truncf %24 : vector<32x64xf32> to vector<32x64xbf16>
    %c0_9 = arith.constant 0 : index
    %c0_10 = arith.constant 0 : index
    %26 = vector.load %arg4[%c0_9, %c0_10] : memref<32x64xbf16, #tpu.memory_space<vmem>>, vector<32x64xbf16>
    tpu.vector_store %arg4[%c0_9, %c0_10], %25 {strides = array<i32>} : memref<32x64xbf16, #tpu.memory_space<vmem>>, vector<32x64xbf16>,
    return
  }
  func.func @transform_0(%arg0: i32) -> (i32, i32) {
    %c0_i32 = arith.constant 0 : i32
    %c0_i32_0 = arith.constant 0 : i32
    return %arg0, %c0_i32 : i32, i32
  }
  func.func @transform_1(%arg0: i32) -> (i32, i32) {
    %c0_i32 = arith.constant 0 : i32
    %c0_i32_0 = arith.constant 0 : i32
    %c0_i32_1 = arith.constant 0 : i32
    return %c0_i32, %c0_i32_0 : i32, i32
  }
  func.func @transform_2(%arg0: i32) -> (i32, i32) {
    %c0_i32 = arith.constant 0 : i32
    %c0_i32_0 = arith.constant 0 : i32
    %c0_i32_1 = arith.constant 0 : i32
    return %c0_i32, %c0_i32_0 : i32, i32
  }
  func.func @transform_3(%arg0: i32) -> (i32, i32) {
    %c0_i32 = arith.constant 0 : i32
    %c0_i32_0 = arith.constant 0 : i32
    return %arg0, %c0_i32 : i32, i32
  }
}

</mosaic_0001>

<bundles_post_ra>
// kernel: tpu_custom_call.1
= control target key start
LH: loop header
LB: loop body
LE: loop exit
PB: predicated region body
PF: predicated region fallthrough
CT: control target
= control target key end

     0   :  { %8 = vsyncpa [#allocation3], 0  ;;  %s287_s0 = inlined_call_operand.hbm [shape: f32[32,64], index: 0, kind: input, shape index: {}]   ;;  %s288_s1 = inlined_call_operand.vmem [shape: f32[1,64], index: 1, kind: input, shape index: {}]   ;;  %s289_s2 = inlined_call_operand.vmem [shape: f32[1,64], index: 2, kind: input, shape index: {}]   ;;  %s290_s3 = inlined_call_operand.hbm [shape: bf16[32,64], index: 3, kind: output, shape index: {}]  }
   0x1   :  { %9 = vsyncpa [#allocation4], 0  ;;  %s219_s12 = smov [#allocation2]   ;;  %s171_s16 = scalar_lea.hbm %s287_s0, 512 }
   0x2   :  { %s15_s13 = sshll.u32 %s219_s12, 4  ;;  %p172_p0 = scmp.ne.s32.totalorder %s287_s0, %s171_s16  ;;  %s16_s13 = int_to_ptr.vmem [resolvable:$true] %s15_s13 }
   0x3   :  { %p175_p1 = scmp.lt.u32.totalorder %s171_s16, %s287_s0 }
   0x5   :  { %p177_p2 = pnand %p175_p1, %p172_p0 }
   0x7   :  { %180 = shalt.err (!%p177_p2)
}
   0x8   :  { %s181_s21 = scalar_lea.vmem %s16_s13, 512  ;;  %p186_p4 = scmp.lt.s32.totalorder %s16_s13, %s16_s13 }
   0x9   :  { %p182_p3 = scmp.ne.s32.totalorder %s16_s13, %s181_s21  ;;  %p187_p5 = scmp.lt.s32.totalorder %s181_s21, %s181_s21 }
   0xb   :  { %p188_p6 = por %p187_p5, %p186_p4 }
   0xd   :  { %p189_p7 = pnand %p188_p6, %p182_p3 }
   0xf   :  { %192 = shalt.err (!%p189_p7)
}
  0x10   :  { %s220_s22 = smov 128   ;;  %s221_s23 = smov 8  }
  0x11   :  { %21 = dma.hbm_to_vmem [thread:$0]  %s287_s0, 512, %s16_s13, [#allocation3], %s220_s22, %s220_s22, %s221_s23  }
  0x12   :  { %215 = dma.done.wait [#allocation3], 512  }
  0x13   :  { %216 = vsyncadd [#allocation3], 4294966784  ;;  %vm33_vm0 = vcmask 523264   ;;  %v29_v0 = vld [vmem:[#allocation2] sm:$0xff]  ;;  %v31_v1 = vld [vmem:[#allocation2 + $0x10] sm:$0xff]  ;;  %vm125_vm1 = vcmask 519168  }
  0x14   :  { %v30_v2 = vld [vmem:[#allocation2 + $0x8] sm:$0xff]  ;;  %v34_v3 = vsel %vm33_vm0, %v29_v0, 0.0  ;;  %v40_v4 = vsel %vm33_vm0, %v31_v1, 0.0  ;;  %v32_v5 = vld [vmem:[#allocation2 + $0x18] sm:$0xff]  ;;  %v147_v41 = vld [vmem:[%s288_s1] ss:$0 sm:$0xff] }
  0x15   :  { %35 = vadd.xlane.f32.xlu0 %v34_v3  ;;  %41 = vadd.xlane.f32.xlu1 %v40_v4  ;;  %v37_v6 = vsel %vm33_vm0, %v30_v2, 0.0  ;;  %v43_v7 = vsel %vm33_vm0, %v32_v5, 0.0  ;;  %v148_v43 = vld [vmem:[%s289_s2] ss:$0 sm:$0xff]  ;;  %s222_s1 = smov [#allocation5]  }
  0x16   :  { %s135_s2 = sshll.u32 %s222_s1, 4  ;;  %s136_s2 = int_to_ptr.vmem [resolvable:$true] %s135_s2 }
  0x17   :  { %s193_s29 = scalar_lea.vmem %s136_s2, 256  ;;  %p198_p9 = scmp.lt.s32.totalorder %s136_s2, %s136_s2 }
  0x18   :  { %p194_p8 = scmp.ne.s32.totalorder %s136_s2, %s193_s29  ;;  %p199_p10 = scmp.lt.s32.totalorder %s193_s29, %s193_s29 }
  0x19   :  { %38 = vadd.xlane.f32.xlu0 %v37_v6  ;;  %44 = vadd.xlane.f32.xlu1 %v43_v7 }
  0x1a   :  { %p200_p11 = por %p199_p10, %p198_p9 }
  0x1c   :  { %p201_p12 = pnand %p200_p11, %p194_p8 }
  0xa2   :  { %v36_v8 = vpop.xlane.xlu0 %35  ;;  %v42_v9 = vpop.xlane.xlu1 %41 }
  0xa3   :  { %v47_v10 = vmul.f32 0.015625, %v36_v8  ;;  %v49_v11 = vmul.f32 0.015625, %v42_v9 }
  0xa5   :  { %v51_v12 = vsub.f32 %v29_v0, %v47_v10  ;;  %v53_v13 = vsub.f32 %v31_v1, %v49_v11 }
  0xa6   :  { %v39_v14 = vpop.xlane.xlu0 %38  ;;  %v45_v15 = vpop.xlane.xlu1 %44 }
  0xa7   :  { %v48_v16 = vmul.f32 0.015625, %v39_v14  ;;  %v50_v17 = vmul.f32 0.015625, %v45_v15  ;;  %v55_v18 = vmul.f32 %v51_v12, %v51_v12  ;;  %v57_v19 = vmul.f32 %v53_v13, %v53_v13 }
  0xa9   :  { %v52_v20 = vsub.f32 %v30_v2, %v48_v16  ;;  %v54_v21 = vsub.f32 %v32_v5, %v50_v17  ;;  %v59_v22 = vsel %vm33_vm0, %v55_v18, 0.0  ;;  %v65_v23 = vsel %vm33_vm0, %v57_v19, 0.0 }
  0xaa   :  { %60 = vadd.xlane.f32.xlu0 %v59_v22 }
  0xab   :  { %v56_v24 = vmul.f32 %v52_v20, %v52_v20  ;;  %v58_v25 = vmul.f32 %v54_v21, %v54_v21 }
  0xad   :  { %v62_v26 = vsel %vm33_vm0, %v56_v24, 0.0  ;;  %v68_v27 = vsel %vm33_vm0, %v58_v25, 0.0 }
  0xae   :  { %66 = vadd.xlane.f32.xlu0 %v65_v23  ;;  %63 = vadd.xlane.f32.xlu1 %v62_v26 }
  0xb2   :  { %69 = vadd.xlane.f32.xlu1 %v68_v27 }
 0x137   :  { %v61_v28 = vpop.xlane.xlu0 %60 }
 0x138   :  { %v71_v29 = vmul.f32 0.015625, %v61_v28 }
 0x13a   :  { %v75_v30 = vadd.f32 1e-05, %v71_v29 }
 0x13b   :  { %v64_v31 = vpop.xlane.xlu1 %63  ;;  %v67_v32 = vpop.xlane.xlu0 %66 }
 0x13c   :  { %163 = vrsqrt.f32 %v75_v30  ;;  %v72_v33 = vmul.f32 0.015625, %v64_v31  ;;  %v73_v34 = vmul.f32 0.015625, %v67_v32 }
 0x13e   :  { %v76_v35 = vadd.f32 1e-05, %v72_v33  ;;  %v77_v36 = vadd.f32 1e-05, %v73_v34 }
 0x13f   :  { %v70_v37 = vpop.xlane.xlu1 %69 }
 0x140   :  { %165 = vrsqrt.f32 %v76_v35  ;;  %v74_v38 = vmul.f32 0.015625, %v70_v37 }
 0x141   :  { %167 = vrsqrt.f32 %v77_v36 }
 0x142   :  { %v78_v39 = vadd.f32 1e-05, %v74_v38 }
 0x144   :  { %169 = vrsqrt.f32 %v78_v39 }
 0x146   :  { %v164_v40 = vpop.eup %163 }
 0x147   :  { %v83_v42 = vmul.f32 %v164_v40, %v51_v12 }
 0x149   :  { %v94_v44 = vmul.f32 %v147_v41, %v83_v42 }
 0x14a   :  { %v166_v45 = vpop.eup %165 }
 0x14b   :  { %v168_v46 = vpop.eup %167  ;;  %v105_v47 = vadd.f32 %v148_v43, %v94_v44  ;;  %v84_v48 = vmul.f32 %v166_v45, %v52_v20 }
 0x14c   :  { %v85_v49 = vmul.f32 %v168_v46, %v53_v13 }
 0x14d   :  { %v153_v50 = vpack.c.bf16 %v105_v47, %v105_v47  ;;  %v95_v51 = vmul.f32 %v147_v41, %v84_v48 }
 0x14e   :  { %v170_v52 = vpop.eup %169  ;;  %v96_v53 = vmul.f32 %v147_v41, %v85_v49 }
 0x14f   :  { %v106_v54 = vadd.f32 %v148_v43, %v95_v51  ;;  %v86_v55 = vmul.f32 %v170_v52, %v54_v21  ;;  %126 = vst.msk [vmem:[#allocation5] sm:$0xf] %vm125_vm1, %v153_v50 }
 0x150   :  { %v107_v56 = vadd.f32 %v148_v43, %v96_v53 }
 0x151   :  { %v154_v57 = vpack.c.bf16 %v106_v54, %v106_v54  ;;  %v97_v58 = vmul.f32 %v147_v41, %v86_v55 }
 0x152   :  { %v155_v59 = vpack.c.bf16 %v107_v56, %v107_v56 }
 0x153   :  { %v108_v60 = vadd.f32 %v148_v43, %v97_v58  ;;  %127 = vst.msk [vmem:[#allocation5 + $0x4] sm:$0xf] %vm125_vm1, %v154_v57 }
 0x154   :  { %128 = vst.msk [vmem:[#allocation5 + $0x8] sm:$0xf] %vm125_vm1, %v155_v59 }
 0x155   :  { %v156_v61 = vpack.c.bf16 %v108_v60, %v108_v60 }
 0x157   :  { %129 = vst.msk [vmem:[#allocation5 + $0xc] sm:$0xf] %vm125_vm1, %v156_v61 }
 0x158   :  { %204 = shalt.err (!%p201_p12)
}
 0x159   :  { %s205_s5 = scalar_lea.hbm %s290_s3, 256 }
 0x15a   :  { %p206_p13 = scmp.ne.s32.totalorder %s290_s3, %s205_s5  ;;  %p209_p0 = scmp.lt.u32.totalorder %s205_s5, %s290_s3 }
 0x15c   :  { %p211_p1 = pnand %p209_p0, %p206_p13 }
 0x15e   :  { %214 = shalt.err (!%p211_p1)
}
 0x15f   :  { %s223_s10 = smov 64   ;;  %s224_s11 = smov 4  }
 0x160   :  { %141 = dma.vmem_to_hbm [thread:$0]  %s136_s2, 256, %s290_s3, [#allocation4], %s223_s10, %s223_s10, %s224_s11  }
 0x161   :  { %217 = dma.done.wait [#allocation4], 256  }
 0x162   :  { %218 = vsyncadd [#allocation4], 4294967040 }
 0x163   :  { %145 = vsyncpa [#allocation3], 1 }
 0x164   :  { %146 = vsyncpa [#allocation4], 1 }

</bundles_post_ra>
